<compile_context>
chip_gen: v7x
topology: tpu7x:2x2x1
jax: 0.10.0
libtpu: 0.0.40
codegen_flags: <defaults>
</compile_context>

<pallas_src>
import functools

import jax
import jax.numpy as jnp
from jax.experimental import pallas as pl
from jax.experimental.pallas import tpu as pltpu


def _cdiv(a, b):
    return -(-a // b)


def _round_up(a, b):
    return _cdiv(a, b) * b


def attention_general_kernel(u_ref, c_ref, enc_ref, out_ref, *, tile_l, valid_l):
    u = u_ref[...]              # (B, H)      same dtype as enc
    enc = enc_ref[...]          # (TL, B, H)  native dtype
    c = c_ref[...]              # (B, 1)      f32

    # e_lb[l, b] = enc[l, b, :] . u[b, :]; multiply in native dtype, accumulate in f32.
    e_lb = jnp.sum(enc * u[None, :, :], axis=-1, dtype=jnp.float32)     # (TL, B)
    e = e_lb.T + c                                                       # (B, TL) lane-dense

    if valid_l is not None:
        # Partial last tile: columns >= valid_l come from OOB (garbage) enc rows; make
        # them benign.  (Their stores are masked by Pallas anyway.)
        col = pl.program_id(0) * tile_l + jax.lax.broadcasted_iota(jnp.int32, e.shape, 1)
        e = jnp.where(col < valid_l, e, 0.0)

    # F.softmax(..., dim=0): softmax over the BATCH axis, exactly as the reference.
    m = jnp.max(e, axis=0, keepdims=True)
    ex = jnp.exp(e - m)
    denom = jnp.sum(ex, axis=0, keepdims=True)
    out_ref[...] = (ex * pl.reciprocal(denom, approx=True)).astype(out_ref.dtype)


def _choose_tile_l(L, B, H, itemsize, budget_bytes):
    """Pick the L-tile from a per-buffer VMEM byte budget (generation-portable)."""
    if L <= 128:
        return L                                     # one tile; block dims == full dims
    # VMEM footprint of one enc "row": trailing (B, H) dims pad to (8, 128) vreg tiles.
    row_bytes = _round_up(B, 8) * _round_up(H, 128) * itemsize
    tl = max(128, (budget_bytes // row_bytes) // 128 * 128)
    # Keep at least 2 tiles so the "parallel" grid axis can feed both v7x TensorCores.
    tl = min(tl, max(128, _round_up(_cdiv(L, 2), 128)))
    return min(tl, _round_up(L, 128))


def attention_layer(hidden, encoder_outputs, weight, bias, *, vmem_budget_bytes=6 << 20):
    """hidden: (1, B, H); encoder_outputs: (L, B, H); weight: (H, H) in PyTorch
    (out_features, in_features) order; bias: (H,).  Returns (B, 1, L)."""
    L, B, H = encoder_outputs.shape
    h2d = hidden.reshape(B, H).astype(jnp.float32)

    # Factored 'general' score, hoisted out of the kernel (tiny O(B*H^2) XLA ops):
    #   h . (W e + bias) = (h @ W) . e + h . bias          (W is (out, in); contract out)
    u = (h2d @ weight.astype(jnp.float32)).astype(encoder_outputs.dtype)   # (B, H)
    c = jnp.sum(h2d * bias.astype(jnp.float32), axis=-1, keepdims=True)    # (B, 1) f32

    itemsize = jnp.dtype(encoder_outputs.dtype).itemsize
    tl = _choose_tile_l(L, B, H, itemsize, vmem_budget_bytes)
    grid_l = _cdiv(L, tl)
    valid_l = L if grid_l * tl != L else None        # partial last tile?

    # VMEM: 2 double-buffered enc tiles + 2 output tiles + resident u/c (padded sizes).
    enc_buf = tl * _round_up(B, 8) * _round_up(H, 128) * itemsize
    out_buf = _round_up(B, 8) * _round_up(tl, 128) * 4
    small = 2 * _round_up(B, 8) * (_round_up(H, 128) + 128) * 4
    vmem_limit = min(64 << 20, max(16 << 20, int(1.5 * (2 * enc_buf + 2 * out_buf + small))))

    kernel = functools.partial(attention_general_kernel, tile_l=tl, valid_l=valid_l)

    # NOTE: for tiny B*H (< one (8,128) vreg tile) a flattened 2-D enc layout would give
    # denser vregs/DMA descriptors; HBM traffic is identical, so the 3-D block is kept.
    energies_sm = pl.pallas_call(
        kernel,
        out_shape=jax.ShapeDtypeStruct((B, L), jnp.float32),
        grid_spec=pltpu.PrefetchScalarGridSpec(
            num_scalar_prefetch=0,
            grid=(grid_l,),
            in_specs=[
                pl.BlockSpec((B, H), lambda i: (0, 0)),          # u   (tiny, resident)
                pl.BlockSpec((B, 1), lambda i: (0, 0)),          # c   (tiny, resident)
                pl.BlockSpec((tl, B, H), lambda i: (i, 0, 0)),   # enc tile (pipelined)
            ],
            out_specs=pl.BlockSpec((B, tl), lambda i: (0, i)),
        ),
        compiler_params=pltpu.CompilerParams(
            dimension_semantics=("parallel",),
            vmem_limit_bytes=vmem_limit,
        ),
    )(u, c, encoder_outputs)

    return energies_sm[:, None, :]                                # (B, 1, L)


def attention_layer_ref(hidden, encoder_outputs, weight, bias):
    """Pure-JAX reference of the PyTorch forward (method='general')."""
    L, B, H = encoder_outputs.shape
    h = hidden.reshape(B, H)
    proj = encoder_outputs @ weight.T + bias            # nn.Linear:  e @ W.T + b
    energies = jnp.einsum('bh,lbh->bl', h, proj)        # (B, L)
    return jax.nn.softmax(energies, axis=0)[:, None, :]


def _run_case(key, B, L, H):
    k_h, k_e, k_w, k_b = jax.random.split(key, 4)
    hidden = jax.random.normal(k_h, (1, B, H), dtype=jnp.float32)
    encoder_outputs = jax.random.normal(k_e, (L, B, H), dtype=jnp.float32)
    bound = 1.0 / jnp.sqrt(H)
    weight = jax.random.uniform(k_w, (H, H), minval=-bound, maxval=bound, dtype=jnp.float32)
    bias = jax.random.uniform(k_b, (H,), minval=-bound, maxval=bound, dtype=jnp.float32)

    out = jax.block_until_ready(attention_layer(hidden, encoder_outputs, weight, bias))
    ref = attention_layer_ref(hidden, encoder_outputs, weight, bias)
    assert out.shape == (B, 1, L), out.shape
    err = float(jnp.max(jnp.abs(out - ref)))
    assert jnp.allclose(out, ref, atol=2e-3, rtol=2e-3), err
    return err


if __name__ == "__main__":
    key = jax.random.PRNGKey(0)
    k1, k2 = jax.random.split(key)
    _run_case(k1, B=2, L=8, H=32)      # single-tile path (small shapes from the module)
    _run_case(k2, B=4, L=300, H=64)    # multi-tile path with a partial last L tile
    print("KERNEL_OK")
</pallas_src>

<mosaic_0001>
module attributes {stable_mosaic.version = 11 : i64} {
  func.func @attention_general_kernel(%arg0: i32, %arg1: memref<2x32xf32, #tpu.memory_space<vmem>>, %arg2: memref<2x1xf32, #tpu.memory_space<vmem>>, %arg3: memref<8x2x32xf32, #tpu.memory_space<vmem>>, %arg4: memref<2x8xf32, #tpu.memory_space<vmem>>) attributes {dimension_semantics = [#tpu.dimension_semantics<parallel>], iteration_bounds = array<i64: 1>, scalar_prefetch = 0 : i64, scratch_operands = 0 : i64, tpu.core_type = #tpu.core_type<tc>, window_params = [{pipeline_mode = #tpu.pipeline_mode<synchronous>, transform_indices = @transform_0, window_bounds = array<i64: 2, 32>}, {pipeline_mode = #tpu.pipeline_mode<synchronous>, transform_indices = @transform_1, window_bounds = array<i64: 2, 1>}, {transform_indices = @transform_2, window_bounds = array<i64: 8, 2, 32>}, {transform_indices = @transform_3, window_bounds = array<i64: 2, 8>}]} {
    %c0 = arith.constant 0 : index
    %c0_0 = arith.constant 0 : index
    %0 = vector.load %arg1[%c0, %c0_0] : memref<2x32xf32, #tpu.memory_space<vmem>>, vector<2x32xf32>
    %c0_1 = arith.constant 0 : index
    %c0_2 = arith.constant 0 : index
    %c0_3 = arith.constant 0 : index
    %1 = vector.load %arg3[%c0_1, %c0_2, %c0_3] : memref<8x2x32xf32, #tpu.memory_space<vmem>>, vector<8x2x32xf32>
    %c0_4 = arith.constant 0 : index
    %c0_5 = arith.constant 0 : index
    %2 = vector.load %arg2[%c0_4, %c0_5] : memref<2x1xf32, #tpu.memory_space<vmem>>, vector<2x1xf32>
    %3 = vector.shape_cast %0 : vector<2x32xf32> to vector<1x2x32xf32>
    %4 = vector.broadcast %3 : vector<1x2x32xf32> to vector<8x2x32xf32>
    %5 = arith.mulf %1, %4 : vector<8x2x32xf32>
    %cst = arith.constant dense<0.000000e+00> : vector<8x2xf32>
    %6 = vector.multi_reduction <add>, %5, %cst [2] : vector<8x2x32xf32> to vector<8x2xf32>
    %7 = tpu.transpose %6, [1, 0] : vector<8x2xf32> -> vector<2x8xf32>
    %8 = vector.broadcast %2 : vector<2x1xf32> to vector<2x8xf32>
    %9 = arith.addf %7, %8 : vector<2x8xf32>
    %cst_6 = arith.constant dense<0xFF800000> : vector<8xf32>
    %10 = vector.multi_reduction <maximumf>, %9, %cst_6 [0] : vector<2x8xf32> to vector<8xf32>
    %11 = vector.shape_cast %10 : vector<8xf32> to vector<1x8xf32>
    %12 = vector.broadcast %11 : vector<1x8xf32> to vector<2x8xf32>
    %13 = arith.subf %9, %12 : vector<2x8xf32>
    %14 = math.exp %13 : vector<2x8xf32>
    %cst_7 = arith.constant dense<0.000000e+00> : vector<8xf32>
    %15 = vector.multi_reduction <add>, %14, %cst_7 [0] : vector<2x8xf32> to vector<8xf32>
    %16 = vector.shape_cast %15 : vector<8xf32> to vector<1x8xf32>
    %17 = tpu.reciprocal %16 {approx = true} : vector<1x8xf32> -> vector<1x8xf32>
    %18 = vector.broadcast %17 : vector<1x8xf32> to vector<2x8xf32>
    %19 = arith.mulf %14, %18 : vector<2x8xf32>
    %c0_8 = arith.constant 0 : index
    %c0_9 = arith.constant 0 : index
    %20 = vector.load %arg4[%c0_8, %c0_9] : memref<2x8xf32, #tpu.memory_space<vmem>>, vector<2x8xf32>
    tpu.vector_store %arg4[%c0_8, %c0_9], %19 {strides = array<i32>} : memref<2x8xf32, #tpu.memory_space<vmem>>, vector<2x8xf32>,
    return
  }
  func.func @transform_0(%arg0: i32) -> (i32, i32) {
    %c0_i32 = arith.constant 0 : i32
    %c0_i32_0 = arith.constant 0 : i32
    %c0_i32_1 = arith.constant 0 : i32
    return %c0_i32, %c0_i32_0 : i32, i32
  }
  func.func @transform_1(%arg0: i32) -> (i32, i32) {
    %c0_i32 = arith.constant 0 : i32
    %c0_i32_0 = arith.constant 0 : i32
    %c0_i32_1 = arith.constant 0 : i32
    return %c0_i32, %c0_i32_0 : i32, i32
  }
  func.func @transform_2(%arg0: i32) -> (i32, i32, i32) {
    %c0_i32 = arith.constant 0 : i32
    %c0_i32_0 = arith.constant 0 : i32
    %c0_i32_1 = arith.constant 0 : i32
    return %arg0, %c0_i32, %c0_i32_0 : i32, i32, i32
  }
  func.func @transform_3(%arg0: i32) -> (i32, i32) {
    %c0_i32 = arith.constant 0 : i32
    %c0_i32_0 = arith.constant 0 : i32
    return %c0_i32, %arg0 : i32, i32
  }
}

</mosaic_0001>

<bundles_post_ra>
// kernel: tpu_custom_call.1
= control target key start
LH: loop header
LB: loop body
LE: loop exit
PB: predicated region body
PF: predicated region fallthrough
CT: control target
= control target key end

     0   :  { %8 = vsyncpa [#allocation3], 0  ;;  %s328_s0 = inlined_call_operand.vmem [shape: f32[2,32], index: 0, kind: input, shape index: {}]   ;;  %s329_s1 = inlined_call_operand.vmem [shape: f32[2,1], index: 1, kind: input, shape index: {}]   ;;  %s330_s2 = inlined_call_operand.hbm [shape: f32[8,2,32], index: 2, kind: input, shape index: {}]   ;;  %s331_s3 = inlined_call_operand.hbm [shape: f32[2,8], index: 3, kind: output, shape index: {}]  }
   0x1   :  { %9 = vsyncpa [#allocation4], 0  ;;  %s262_s12 = smov [#allocation2]   ;;  %s214_s16 = scalar_lea.hbm %s330_s2, 256 }
   0x2   :  { %s19_s13 = sshll.u32 %s262_s12, 4  ;;  %p215_p0 = scmp.ne.s32.totalorder %s330_s2, %s214_s16  ;;  %s20_s13 = int_to_ptr.vmem [resolvable:$true] %s19_s13 }
   0x3   :  { %p218_p1 = scmp.lt.u32.totalorder %s214_s16, %s330_s2 }
   0x5   :  { %p220_p2 = pnand %p218_p1, %p215_p0 }
   0x7   :  { %223 = shalt.err (!%p220_p2)
}
   0x8   :  { %s224_s21 = scalar_lea.vmem %s20_s13, 256  ;;  %p229_p4 = scmp.lt.s32.totalorder %s20_s13, %s20_s13 }
   0x9   :  { %p225_p3 = scmp.ne.s32.totalorder %s20_s13, %s224_s21  ;;  %p230_p5 = scmp.lt.s32.totalorder %s224_s21, %s224_s21 }
   0xb   :  { %p231_p6 = por %p230_p5, %p229_p4 }
   0xd   :  { %p232_p7 = pnand %p231_p6, %p225_p3 }
   0xf   :  { %235 = shalt.err (!%p232_p7)
}
  0x10   :  { %s263_s22 = smov 32   ;;  %s264_s23 = smov 2  }
  0x11   :  { %25 = dma.hbm_to_vmem [thread:$0]  %s330_s2, 256, %s20_s13, [#allocation3], %s263_s22, %s263_s22, %s264_s23  }
  0x12   :  { %258 = dma.done.wait [#allocation3], 256  }
  0x13   :  { %259 = vsyncadd [#allocation3], 4294967040  ;;  %vm47_vm0 = vcmask 254976   ;;  %v29_v0 = vld [vmem:[%s328_s0] sm:$0x3]  ;;  %v265_v25 = vmov 0   ;;  %v80_v27 = vlaneseq }
  0x14   :  { %v30_v1 = vld [vmem:[#allocation2] sm:$0x3]  ;;  %v32_v2 = vld [vmem:[#allocation2 + $0x4] sm:$0x3]  ;;  %v31_v5 = vld [vmem:[#allocation2 + $0x2] sm:$0x3]  ;;  %209 = vset.pattern.permute.xlu0 %v265_v25 }
  0x15   :  { %v39_v3 = vmul.f32 %v30_v1, %v29_v0  ;;  %v41_v4 = vmul.f32 %v32_v2, %v29_v0  ;;  %v33_v6 = vld [vmem:[#allocation2 + $0x6] sm:$0x3]  ;;  %v40_v7 = vmul.f32 %v31_v5, %v29_v0  ;;  %v34_v9 = vld [vmem:[#allocation2 + $0x8] sm:$0x3]  ;;  %v35_v10 = vld [vmem:[#allocation2 + $0xa] sm:$0x3] }
  0x16   :  { %v42_v8 = vmul.f32 %v33_v6, %v29_v0  ;;  %v43_v15 = vmul.f32 %v34_v9, %v29_v0  ;;  %v44_v16 = vmul.f32 %v35_v10, %v29_v0  ;;  %v36_v17 = vld [vmem:[#allocation2 + $0xc] sm:$0x3]  ;;  %v37_v18 = vld [vmem:[#allocation2 + $0xe] sm:$0x3]  ;;  %v38_v26 = vld [vmem:[%s329_s1] sm:$0x3] }
  0x17   :  { %v48_v11 = vsel %vm47_vm0, %v39_v3, 0.0  ;;  %v54_v12 = vsel %vm47_vm0, %v41_v4, 0.0  ;;  %v51_v13 = vsel %vm47_vm0, %v40_v7, 0.0  ;;  %v45_v21 = vmul.f32 %v36_v17, %v29_v0  ;;  %s266_s1 = smov [#allocation5]  }
  0x18   :  { %49 = vadd.xlane.f32.xlu0 %v48_v11  ;;  %55 = vadd.xlane.f32.xlu1 %v54_v12  ;;  %v57_v14 = vsel %vm47_vm0, %v42_v8, 0.0  ;;  %v60_v19 = vsel %vm47_vm0, %v43_v15, 0.0  ;;  %v63_v20 = vsel %vm47_vm0, %v44_v16, 0.0  ;;  %v46_v22 = vmul.f32 %v37_v18, %v29_v0  ;;  %s194_s28 = sshll.u32 %s266_s1, 4  ;;  %s195_s28 = int_to_ptr.vmem [resolvable:$true] %s194_s28 }
  0x19   :  { %v66_v23 = vsel %vm47_vm0, %v45_v21, 0.0  ;;  %v81_v28 = vand.u32 127, %v80_v27  ;;  %v83_v29 = vshrl.u32 %v80_v27, 7  ;;  %vm114_vm1 = vcmask 1041409   ;;  %s236_s29 = scalar_lea.vmem %s195_s28, 32  ;;  %p241_p9 = scmp.lt.s32.totalorder %s195_s28, %s195_s28 }
  0x1a   :  { %v69_v24 = vsel %vm47_vm0, %v46_v22, 0.0  ;;  %vm116_vm2 = vcmask 1042434   ;;  %vm118_vm3 = vcmask 1043459   ;;  %vm120_vm4 = vcmask 1044484   ;;  %p237_p8 = scmp.ne.s32.totalorder %s195_s28, %s236_s29  ;;  %p242_p10 = scmp.lt.s32.totalorder %s236_s29, %s236_s29 }
  0x1b   :  { %v84_v32 = vsub.s32 %v81_v28, %v83_v29  ;;  %vm122_vm5 = vcmask 1045509   ;;  %vm124_vm6 = vcmask 1046534   ;;  %vm126_vm7 = vcmask 1047559  }
  0x1c   :  { %52 = vadd.xlane.f32.xlu0 %v51_v13  ;;  %58 = vadd.xlane.f32.xlu1 %v57_v14  ;;  %vm167_vm8 = vcmask 58368   ;;  %p243_p11 = por %p242_p10, %p241_p9 }
  0x1e   :  { %p244_p12 = pnand %p243_p11, %p237_p8 }
  0x20   :  { %61 = vadd.xlane.f32.xlu0 %v60_v19  ;;  %64 = vadd.xlane.f32.xlu1 %v63_v20 }
  0x24   :  { %67 = vadd.xlane.f32.xlu0 %v66_v23  ;;  %70 = vadd.xlane.f32.xlu1 %v69_v24 }
  0x3a   :  { %163 = vperm.xlu0 %209, %v38_v26  }
  0xa5   :  { %v50_v30 = vpop.xlane.xlu0 %49  ;;  %v56_v31 = vpop.xlane.xlu1 %55 }
  0xa6   :  { %v85_v35 = vrot.slane %v50_v30, %v84_v32  ;;  %v93_v38 = vrot.slane %v56_v31, %v84_v32 }
  0xa9   :  { %v53_v33 = vpop.xlane.xlu0 %52  ;;  %v59_v34 = vpop.xlane.xlu1 %58 }
  0xaa   :  { %v89_v36 = vrot.slane %v53_v33, %v84_v32  ;;  %v97_v37 = vrot.slane %v59_v34, %v84_v32 }
  0xac   :  { %v115_v39 = vsel %vm114_vm1, %v89_v36, %v85_v35 }
  0xad   :  { %v117_v40 = vsel %vm116_vm2, %v93_v38, %v115_v39  ;;  %v62_v41 = vpop.xlane.xlu0 %61  ;;  %v65_v42 = vpop.xlane.xlu1 %64 }
  0xae   :  { %v119_v43 = vsel %vm118_vm3, %v97_v37, %v117_v40  ;;  %v101_v44 = vrot.slane %v62_v41, %v84_v32  ;;  %v105_v45 = vrot.slane %v65_v42, %v84_v32 }
  0xb0   :  { %v121_v46 = vsel %vm120_vm4, %v101_v44, %v119_v43 }
  0xb1   :  { %v68_v47 = vpop.xlane.xlu0 %67  ;;  %v71_v48 = vpop.xlane.xlu1 %70  ;;  %v123_v51 = vsel %vm122_vm5, %v105_v45, %v121_v46 }
  0xb2   :  { %v109_v49 = vrot.slane %v68_v47, %v84_v32  ;;  %v113_v50 = vrot.slane %v71_v48, %v84_v32 }
  0xb4   :  { %v125_v52 = vsel %vm124_vm6, %v109_v49, %v123_v51 }
  0xb5   :  { %v127_v53 = vsel %vm126_vm7, %v113_v50, %v125_v52 }
  0xb6   :  { %129 = vxpose.xlu1.b32.start.end [1/1] (short) (narrow) %v127_v53, 8 }
  0xb9   :  { %v164_v54 = vpop.permute.xlu0 %163 }
 0x136   :  { %v145_v55 = vpop.trf.xlu1 }
 0x137   :  { %v166_v56 = vadd.f32 %v164_v54, %v145_v55 }
 0x139   :  { %v168_v57 = vsel %vm167_vm8, %v166_v56, -inf }
 0x13a   :  { %v169_v58 = vrot.slane %v168_v57, 4 }
 0x13c   :  { %v170_v59 = vmax.f32 %v168_v57, %v169_v58 }
 0x13e   :  { %v171_v60 = vrot.slane %v170_v59, 2 }
 0x140   :  { %v172_v61 = vmax.f32 %v170_v59, %v171_v60 }
 0x142   :  { %v173_v62 = vrot.slane %v172_v61, 1 }
 0x144   :  { %v174_v63 = vmax.f32 %v172_v61, %v173_v62 }
 0x146   :  { %v175_v0 = vsub.f32 %v166_v56, %v174_v63 }
 0x148   :  { %v176_v1 = vmul.f32 1.442695, %v175_v0 }
 0x14a   :  { %210 = vpow2.f32 %v176_v1 }
 0x154   :  { %v211_v2 = vpop.eup %210 }
 0x155   :  { %v178_v3 = vsel %vm167_vm8, %v211_v2, 0.0 }
 0x156   :  { %v179_v4 = vrot.slane %v178_v3, 4 }
 0x158   :  { %v180_v5 = vadd.f32 %v179_v4, %v178_v3 }
 0x15a   :  { %v181_v6 = vrot.slane %v180_v5, 2 }
 0x15c   :  { %v182_v7 = vadd.f32 %v181_v6, %v180_v5 }
 0x15e   :  { %v183_v8 = vrot.slane %v182_v7, 1 }
 0x160   :  { %v184_v9 = vadd.f32 %v183_v8, %v182_v7 }
 0x162   :  { %212 = vrcp.f32 %v184_v9 }
 0x16c   :  { %v213_v10 = vpop.eup %212 }
 0x16d   :  { %v186_v11 = vmul.f32 %v213_v10, %v211_v2 }
 0x16f   :  { %187 = vst.msk [vmem:[#allocation5] sm:$0x3] %vm167_vm8, %v186_v11 }
 0x170   :  { %247 = shalt.err (!%p244_p12)
}
 0x171   :  { %s248_s5 = scalar_lea.hbm %s331_s3, 32 }
 0x172   :  { %p249_p13 = scmp.ne.s32.totalorder %s331_s3, %s248_s5  ;;  %p252_p0 = scmp.lt.u32.totalorder %s248_s5, %s331_s3 }
 0x174   :  { %p254_p1 = pnand %p252_p0, %p249_p13 }
 0x176   :  { %257 = shalt.err (!%p254_p1)
}
 0x177   :  { %197 = dma.vmem_to_hbm [thread:$0]  %s195_s28, 32, %s331_s3, [#allocation4]  }
 0x178   :  { %260 = dma.done.wait [#allocation4], 32  }
 0x179   :  { %261 = vsyncadd [#allocation4], 4294967264 }
 0x17a   :  { %201 = vsyncpa [#allocation3], 1 }
 0x17b   :  { %202 = vsyncpa [#allocation4], 1 }

</bundles_post_ra>
